<compile_context>
chip_gen: v7x
topology: tpu7x:2x2x1
jax: 0.10.0
libtpu: 0.0.40
codegen_flags: <defaults>
</compile_context>

<pallas_src>
import functools
import math

import jax
import jax.numpy as jnp
from jax import lax
from jax.experimental import pallas as pl
from jax.experimental.pallas import tpu as pltpu

EPS = 1e-5


def _down_kernel(x_ref, wb1_ref, wb2_ref, g1_ref, be1_ref, g2_ref, be2_ref,
                 p_ref, pt_ref, o_ref, *, N, Ho, Wo, Cin, Cp):
    R = N * Ho                     # rows of every activation slab
    ci_lanes = Wo * Cin            # lanes of the pooled slab / conv1 K
    cnt = float(N * Ho * Wo)       # BN normalizer (biased batch statistics)

    # ---- MaxPool2d(2), vertical half (horizontal half done in the wrapper).
    # The two vertical partner rows sit side by side on the lane axis, so the
    # pairing is two static lane slices; upcast to f32 for the element-wise
    # pipeline (matmul inputs are cast to bf16 right at each dot).
    xp = jnp.maximum(x_ref[:, :ci_lanes],
                     x_ref[:, ci_lanes:]).astype(jnp.float32)   # (R, Wo*Cin)

    # ---- dy-halo validity masks (per-image H boundary).
    ho = jax.lax.broadcasted_iota(jnp.int32, (R, 1), 0) % Ho
    m_up = ho >= 1                 # row h-1 exists
    m_dn = ho <= Ho - 2            # row h+1 exists

    def conv3x3(slab, wb_ref):
        # One MXU matmul per kernel row dy; the dx taps + channels are folded
        # into K by the block-banded bf16 weights (which also implement the
        # conv's zero padding along W).  dy halo = sublane roll + edge mask,
        # applied on the input side (input slab width <= output slab width).
        acc = jnp.dot(slab.astype(jnp.bfloat16), wb_ref[1],
                      preferred_element_type=jnp.float32)
        up = jnp.where(m_up, pltpu.roll(slab, 1, 0), 0.0)        # row r-1
        acc = acc + jnp.dot(up.astype(jnp.bfloat16), wb_ref[0],
                            preferred_element_type=jnp.float32)
        dn = jnp.where(m_dn, pltpu.roll(slab, R - 1, 0), 0.0)    # row r+1
        acc = acc + jnp.dot(dn.astype(jnp.bfloat16), wb_ref[2],
                            preferred_element_type=jnp.float32)
        return acc                                               # (R, Wo*Cp) f32

    def bn_relu(y, g_ref, be_ref):
        # Training-mode BN fused into one y*scale + shift sweep (+ReLU), all
        # stat math in f32.  Conv bias is omitted upstream: a per-channel
        # constant is exactly cancelled by the batch-mean subtraction here.
        s1 = jnp.dot(jnp.sum(y, axis=0, keepdims=True), p_ref[...],
                     preferred_element_type=jnp.float32)         # (1, Cp)
        s2 = jnp.dot(jnp.sum(y * y, axis=0, keepdims=True), p_ref[...],
                     preferred_element_type=jnp.float32)
        mean = s1 / cnt
        var = jnp.maximum(s2 / cnt - mean * mean, 0.0)           # clamp: no NaN
        scale = g_ref[...] * lax.rsqrt(var + EPS)                # (1, Cp)
        shift = be_ref[...] - mean * scale
        scale_f = jnp.dot(scale, pt_ref[...],
                          preferred_element_type=jnp.float32)    # (1, Wo*Cp)
        shift_f = jnp.dot(shift, pt_ref[...],
                          preferred_element_type=jnp.float32)
        return jnp.maximum(y * scale_f + shift_f, 0.0)

    y1 = bn_relu(conv3x3(xp, wb1_ref), g1_ref, be1_ref)          # (R, Wo*Cp)
    y2 = bn_relu(conv3x3(y1, wb2_ref), g2_ref, be2_ref)
    o_ref[...] = y2


def _banded_weights(w_hwio, Wo, ci_block, co_block):
    """Block-banded bf16 matmul weights for a 3x3 'same' conv on a
    (rows, Wo*ci_block) slab.

        wb[dy, wp*ci_block + ci, wo*co_block + co] = w_hwio[dy, wp-wo+1, ci, co]

    for |wp - wo| <= 1 and 0 <= wp < Wo; every other entry is zero, which
    implements the conv's zero padding along W.  ci_block / co_block may
    exceed the true channel counts (lane padding); padded rows/cols stay zero.
    """
    _, _, Ci, Co = w_hwio.shape
    wb = jnp.zeros((3, Wo * ci_block, Wo * co_block), jnp.float32)
    for dxi in range(3):
        for wo in range(Wo):
            wp = wo + dxi - 1
            if 0 <= wp < Wo:
                r0, c0 = wp * ci_block, wo * co_block
                wb = wb.at[:, r0:r0 + Ci, c0:c0 + Co].set(w_hwio[:, dxi])
    return wb.astype(jnp.bfloat16)


def down_pallas(x_nchw, params):
    """Forward pass of Down; input/output are NCHW float32 like PyTorch."""
    w1, b1, g1, be1, w2, b2, g2, be2 = params
    del b1, b2  # cancelled by training-mode BN mean subtraction (see kernel)
    N, Cin, H, W = x_nchw.shape
    assert H % 2 == 0 and W % 2 == 0
    Ho, Wo = H // 2, W // 2
    Cout = w1.shape[-1]

    # Pad Cout -> Cp so the output / matmul-N lane width Wo*Cp is a multiple
    # of 128 (unmasked stores, fuller MXU N fill).
    step = 128 // math.gcd(Wo, 128)
    Cp = ((Cout + step - 1) // step) * step

    # NCHW -> NHWC, horizontal half of MaxPool2d(2) in the wrapper (halves
    # conv1's K and wb1), then a free reshape putting the two vertical-pool
    # partner rows side by side on the lane axis.  bf16 halves the input DMA.
    x = jnp.transpose(x_nchw, (0, 2, 3, 1)).astype(jnp.float32)   # (N,H,W,Cin)
    x = jnp.max(x.reshape(N, H, Wo, 2, Cin), axis=3)              # (N,H,Wo,Cin)
    x2 = x.reshape(N * Ho, 2 * Wo * Cin).astype(jnp.bfloat16)

    # Block-banded bf16 conv weights (built once, outside the kernel).  Conv2
    # input blocks are Cp wide but only the first Cout rows per block are
    # nonzero (padded channels of y1 are exactly zero anyway).
    wb1 = _banded_weights(w1.astype(jnp.float32), Wo, Cin, Cp)
    wb2 = _banded_weights(w2.astype(jnp.float32), Wo, Cp, Cp)

    def pad_c(v):
        v = jnp.reshape(v, (1, -1)).astype(jnp.float32)
        return jnp.pad(v, ((0, 0), (0, Cp - Cout)))

    g1p, be1p, g2p, be2p = pad_c(g1), pad_c(be1), pad_c(g2), pad_c(be2)

    # Static 0/1 channel fold (P) / broadcast (PT) matrices for the fused BN,
    # hoisted out of the kernel (f32 so the stat matmuls stay exact).
    col = jnp.arange(Wo * Cp, dtype=jnp.int32) % Cp
    P = (col[:, None] == jnp.arange(Cp, dtype=jnp.int32)[None, :]
         ).astype(jnp.float32)                                    # (Wo*Cp, Cp)
    PT = P.T                                                      # (Cp, Wo*Cp)

    kernel = functools.partial(_down_kernel, N=N, Ho=Ho, Wo=Wo, Cin=Cin, Cp=Cp)

    # Single kernel invocation (no grid): training-mode BN needs full-batch
    # statistics and the whole problem fits in VMEM, so every operand maps
    # whole into VMEM — no 2-deep pipelining / duplicated buffers.
    # v7x note: this runs on one TensorCore; a Cout-split grid axis for
    # conv2+BN2 would be needed to occupy the second TC at scale.
    out2d = pl.pallas_call(
        kernel,
        out_shape=jax.ShapeDtypeStruct((N * Ho, Wo * Cp), jnp.float32),
        in_specs=[pl.BlockSpec(memory_space=pltpu.MemorySpace.VMEM)
                  for _ in range(9)],
        out_specs=pl.BlockSpec(memory_space=pltpu.MemorySpace.VMEM),
        compiler_params=pltpu.CompilerParams(
            vmem_limit_bytes=32 * 1024 * 1024),
    )(x2, wb1, wb2, g1p, be1p, g2p, be2p, P, PT)

    # Lane-dense slab -> NHWC (drop channel padding) -> NCHW (layout only).
    out = out2d.reshape(N, Ho, Wo, Cp)[..., :Cout]
    return jnp.transpose(out, (0, 3, 1, 2))


def down_ref(x_nchw, params):
    """Pure-JAX reference (mirrors the PyTorch forward, training-mode BN)."""
    w1, b1, g1, be1, w2, b2, g2, be2 = params
    x = lax.reduce_window(x_nchw, -jnp.inf, lax.max,
                          (1, 1, 2, 2), (1, 1, 2, 2), 'VALID')

    def conv_bn_relu(x, w, b, g, be):
        y = lax.conv_general_dilated(
            x, w, (1, 1), ((1, 1), (1, 1)),
            dimension_numbers=('NCHW', 'HWIO', 'NCHW'))
        y = y + b.reshape(1, -1, 1, 1)
        mean = jnp.mean(y, axis=(0, 2, 3), keepdims=True)
        var = jnp.mean(jnp.square(y - mean), axis=(0, 2, 3), keepdims=True)
        yn = (y - mean) / jnp.sqrt(var + EPS)
        yn = yn * g.reshape(1, -1, 1, 1) + be.reshape(1, -1, 1, 1)
        return jnp.maximum(yn, 0.0)

    x = conv_bn_relu(x, w1, b1.reshape(-1), g1.reshape(-1), be1.reshape(-1))
    x = conv_bn_relu(x, w2, b2.reshape(-1), g2.reshape(-1), be2.reshape(-1))
    return x


if __name__ == "__main__":
    N, Cin, Cout, H, W = 2, 4, 8, 16, 16

    key = jax.random.PRNGKey(0)
    k = jax.random.split(key, 5)
    x = jax.random.normal(k[0], (N, Cin, H, W), jnp.float32)

    # Deterministic synthetic parameters (Conv2d weights HWIO, BN gamma/beta).
    w1 = jax.random.normal(k[1], (3, 3, Cin, Cout), jnp.float32) / (3 * 3 * Cin) ** 0.5
    b1 = jax.random.normal(k[2], (1, Cout), jnp.float32) * 0.1
    w2 = jax.random.normal(k[3], (3, 3, Cout, Cout), jnp.float32) / (3 * 3 * Cout) ** 0.5
    b2 = jax.random.normal(k[4], (1, Cout), jnp.float32) * 0.1
    g1 = jnp.ones((1, Cout), jnp.float32)
    be1 = jnp.zeros((1, Cout), jnp.float32)
    g2 = jnp.ones((1, Cout), jnp.float32)
    be2 = jnp.zeros((1, Cout), jnp.float32)
    params = (w1, b1, g1, be1, w2, b2, g2, be2)

    out = jax.jit(down_pallas)(x, params)
    out = jax.block_until_ready(out)

    assert out.shape == (N, Cout, H // 2, W // 2)
    ref = down_ref(x, params)
    # bf16 MXU inputs (activations + weights) vs. a pure-f32 reference through
    # two conv+BN stages -> tolerance reflects bf16 input rounding, not f32.
    assert jnp.allclose(out, ref, atol=5e-2, rtol=5e-2)

    print("KERNEL_OK")
</pallas_src>

<mosaic_0001>
module attributes {stable_mosaic.version = 11 : i64} {
  func.func @_down_kernel(%arg0: memref<16x64xbf16, #tpu.memory_space<vmem>>, %arg1: memref<3x32x128xbf16, #tpu.memory_space<vmem>>, %arg2: memref<3x128x128xbf16, #tpu.memory_space<vmem>>, %arg3: memref<1x16xf32, #tpu.memory_space<vmem>>, %arg4: memref<1x16xf32, #tpu.memory_space<vmem>>, %arg5: memref<1x16xf32, #tpu.memory_space<vmem>>, %arg6: memref<1x16xf32, #tpu.memory_space<vmem>>, %arg7: memref<128x16xf32, #tpu.memory_space<vmem>>, %arg8: memref<16x128xf32, #tpu.memory_space<vmem>>, %arg9: memref<16x128xf32, #tpu.memory_space<vmem>>) attributes {dimension_semantics = [], scalar_prefetch = 0 : i64, scratch_operands = 0 : i64, tpu.core_type = #tpu.core_type<tc>} {
    %c0 = arith.constant 0 : index
    %c0_0 = arith.constant 0 : index
    %0 = vector.load %arg0[%c0, %c0_0] : memref<16x64xbf16, #tpu.memory_space<vmem>>, vector<16x32xbf16>
    %c0_1 = arith.constant 0 : index
    %c32 = arith.constant 32 : index
    %1 = vector.load %arg0[%c0_1, %c32] : memref<16x64xbf16, #tpu.memory_space<vmem>>, vector<16x32xbf16>
    %2 = arith.maximumf %0, %1 : vector<16x32xbf16>
    %3 = arith.extf %2 : vector<16x32xbf16> to vector<16x32xf32>
    %4 = tpu.iota {dimensions = array<i32: 0>} : vector<16x1xi32>
    %c8_i32 = arith.constant 8 : i32
    %c0_i32 = arith.constant 0 : i32
    %5 = arith.cmpi eq, %c8_i32, %c0_i32 : i32
    %c1_i32 = arith.constant 1 : i32
    %6 = arith.select %5, %c1_i32, %c8_i32 : i32
    %7 = vector.broadcast %6 : i32 to vector<16x1xi32>
    %8 = arith.remsi %4, %7 : vector<16x1xi32>
    %c0_i32_2 = arith.constant 0 : i32
    %9 = vector.broadcast %c0_i32_2 : i32 to vector<16x1xi32>
    %10 = arith.cmpi ne, %8, %9 : vector<16x1xi32>
    %c0_i32_3 = arith.constant 0 : i32
    %11 = vector.broadcast %c0_i32_3 : i32 to vector<16x1xi32>
    %12 = arith.cmpi slt, %8, %11 : vector<16x1xi32>
    %c0_i32_4 = arith.constant 0 : i32
    %13 = arith.cmpi slt, %6, %c0_i32_4 : i32
    %14 = vector.broadcast %13 : i1 to vector<16x1xi1>
    %15 = vector.broadcast %14 : vector<16x1xi1> to vector<16x1xi1>
    %16 = arith.xori %12, %15 : vector<16x1xi1>
    %17 = arith.andi %16, %10 : vector<16x1xi1>
    %18 = vector.broadcast %6 : i32 to vector<16x1xi32>
    %19 = arith.addi %8, %18 : vector<16x1xi32>
    %20 = arith.select %17, %19, %8 : vector<16x1xi1>, vector<16x1xi32>
    %c1_i32_5 = arith.constant 1 : i32
    %21 = vector.broadcast %c1_i32_5 : i32 to vector<16x1xi32>
    %22 = arith.cmpi sge, %20, %21 : vector<16x1xi32>
    %c6_i32 = arith.constant 6 : i32
    %23 = vector.broadcast %c6_i32 : i32 to vector<16x1xi32>
    %24 = arith.cmpi sle, %20, %23 : vector<16x1xi32>
    %25 = arith.truncf %3 : vector<16x32xf32> to vector<16x32xbf16>
    %c1 = arith.constant 1 : index
    %c0_6 = arith.constant 0 : index
    %c0_7 = arith.constant 0 : index
    %26 = vector.load %arg1[%c1, %c0_6, %c0_7] : memref<3x32x128xbf16, #tpu.memory_space<vmem>>, vector<1x32x128xbf16>
    %27 = vector.shape_cast %26 : vector<1x32x128xbf16> to vector<32x128xbf16>
    %cst = arith.constant dense<0.000000e+00> : vector<16x128xf32>
    %28 = tpu.matmul %25, %27, %cst {dimension_numbers = #tpu.dot_dimension_numbers<[1], [0], [0], [1], [0, 0, 1, 1], [], []>} : vector<16x32xbf16>, vector<32x128xbf16>, vector<16x128xf32> -> vector<16x128xf32>
    %c1_i32_8 = arith.constant 1 : i32
    %29 = tpu.dynamic_rotate %3 by %c1_i32_8 dim 0 : vector<16x32xf32>, i32 -> vector<16x32xf32>
    %cst_9 = arith.constant 0.000000e+00 : f32
    %30 = vector.shape_cast %22 : vector<16x1xi1> to vector<16x1xi1>
    %31 = vector.broadcast %30 : vector<16x1xi1> to vector<16x32xi1>
    %32 = vector.broadcast %cst_9 : f32 to vector<16x32xf32>
    %33 = arith.select %31, %29, %32 : vector<16x32xi1>, vector<16x32xf32>
    %34 = arith.truncf %33 : vector<16x32xf32> to vector<16x32xbf16>
    %c0_10 = arith.constant 0 : index
    %c0_11 = arith.constant 0 : index
    %c0_12 = arith.constant 0 : index
    %35 = vector.load %arg1[%c0_10, %c0_11, %c0_12] : memref<3x32x128xbf16, #tpu.memory_space<vmem>>, vector<1x32x128xbf16>
    %36 = vector.shape_cast %35 : vector<1x32x128xbf16> to vector<32x128xbf16>
    %cst_13 = arith.constant dense<0.000000e+00> : vector<16x128xf32>
    %37 = tpu.matmul %34, %36, %cst_13 {dimension_numbers = #tpu.dot_dimension_numbers<[1], [0], [0], [1], [0, 0, 1, 1], [], []>} : vector<16x32xbf16>, vector<32x128xbf16>, vector<16x128xf32> -> vector<16x128xf32>
    %38 = arith.addf %28, %37 : vector<16x128xf32>
    %c15_i32 = arith.constant 15 : i32
    %39 = tpu.dynamic_rotate %3 by %c15_i32 dim 0 : vector<16x32xf32>, i32 -> vector<16x32xf32>
    %cst_14 = arith.constant 0.000000e+00 : f32
    %40 = vector.shape_cast %24 : vector<16x1xi1> to vector<16x1xi1>
    %41 = vector.broadcast %40 : vector<16x1xi1> to vector<16x32xi1>
    %42 = vector.broadcast %cst_14 : f32 to vector<16x32xf32>
    %43 = arith.select %41, %39, %42 : vector<16x32xi1>, vector<16x32xf32>
    %44 = arith.truncf %43 : vector<16x32xf32> to vector<16x32xbf16>
    %c2 = arith.constant 2 : index
    %c0_15 = arith.constant 0 : index
    %c0_16 = arith.constant 0 : index
    %45 = vector.load %arg1[%c2, %c0_15, %c0_16] : memref<3x32x128xbf16, #tpu.memory_space<vmem>>, vector<1x32x128xbf16>
    %46 = vector.shape_cast %45 : vector<1x32x128xbf16> to vector<32x128xbf16>
    %cst_17 = arith.constant dense<0.000000e+00> : vector<16x128xf32>
    %47 = tpu.matmul %44, %46, %cst_17 {dimension_numbers = #tpu.dot_dimension_numbers<[1], [0], [0], [1], [0, 0, 1, 1], [], []>} : vector<16x32xbf16>, vector<32x128xbf16>, vector<16x128xf32> -> vector<16x128xf32>
    %48 = arith.addf %38, %47 : vector<16x128xf32>
    %cst_18 = arith.constant dense<0.000000e+00> : vector<128xf32>
    %49 = vector.multi_reduction <add>, %48, %cst_18 [0] : vector<16x128xf32> to vector<128xf32>
    %50 = vector.shape_cast %49 : vector<128xf32> to vector<1x128xf32>
    %c0_19 = arith.constant 0 : index
    %c0_20 = arith.constant 0 : index
    %51 = vector.load %arg7[%c0_19, %c0_20] : memref<128x16xf32, #tpu.memory_space<vmem>>, vector<128x16xf32>
    %cst_21 = arith.constant dense<0.000000e+00> : vector<1x16xf32>
    %52 = tpu.matmul %50, %51, %cst_21 {dimension_numbers = #tpu.dot_dimension_numbers<[1], [0], [0], [1], [0, 0, 1, 1], [], []>} : vector<1x128xf32>, vector<128x16xf32>, vector<1x16xf32> -> vector<1x16xf32>
    %53 = arith.mulf %48, %48 : vector<16x128xf32>
    %cst_22 = arith.constant dense<0.000000e+00> : vector<128xf32>
    %54 = vector.multi_reduction <add>, %53, %cst_22 [0] : vector<16x128xf32> to vector<128xf32>
    %55 = vector.shape_cast %54 : vector<128xf32> to vector<1x128xf32>
    %c0_23 = arith.constant 0 : index
    %c0_24 = arith.constant 0 : index
    %56 = vector.load %arg7[%c0_23, %c0_24] : memref<128x16xf32, #tpu.memory_space<vmem>>, vector<128x16xf32>
    %cst_25 = arith.constant dense<0.000000e+00> : vector<1x16xf32>
    %57 = tpu.matmul %55, %56, %cst_25 {dimension_numbers = #tpu.dot_dimension_numbers<[1], [0], [0], [1], [0, 0, 1, 1], [], []>} : vector<1x128xf32>, vector<128x16xf32>, vector<1x16xf32> -> vector<1x16xf32>
    %cst_26 = arith.constant 1.280000e+02 : f32
    %58 = vector.broadcast %cst_26 : f32 to vector<1x16xf32>
    %59 = arith.divf %52, %58 : vector<1x16xf32>
    %cst_27 = arith.constant 1.280000e+02 : f32
    %60 = vector.broadcast %cst_27 : f32 to vector<1x16xf32>
    %61 = arith.divf %57, %60 : vector<1x16xf32>
    %62 = arith.mulf %59, %59 : vector<1x16xf32>
    %63 = arith.subf %61, %62 : vector<1x16xf32>
    %cst_28 = arith.constant 0.000000e+00 : f32
    %64 = vector.broadcast %cst_28 : f32 to vector<1x16xf32>
    %65 = arith.maximumf %63, %64 : vector<1x16xf32>
    %c0_29 = arith.constant 0 : index
    %c0_30 = arith.constant 0 : index
    %66 = vector.load %arg3[%c0_29, %c0_30] : memref<1x16xf32, #tpu.memory_space<vmem>>, vector<1x16xf32>
    %cst_31 = arith.constant 9.99999974E-6 : f32
    %67 = vector.broadcast %cst_31 : f32 to vector<1x16xf32>
    %68 = arith.addf %65, %67 : vector<1x16xf32>
    %69 = math.rsqrt %68 : vector<1x16xf32>
    %70 = arith.mulf %66, %69 : vector<1x16xf32>
    %c0_32 = arith.constant 0 : index
    %c0_33 = arith.constant 0 : index
    %71 = vector.load %arg4[%c0_32, %c0_33] : memref<1x16xf32, #tpu.memory_space<vmem>>, vector<1x16xf32>
    %72 = arith.mulf %59, %70 : vector<1x16xf32>
    %73 = arith.subf %71, %72 : vector<1x16xf32>
    %c0_34 = arith.constant 0 : index
    %c0_35 = arith.constant 0 : index
    %74 = vector.load %arg8[%c0_34, %c0_35] : memref<16x128xf32, #tpu.memory_space<vmem>>, vector<16x128xf32>
    %cst_36 = arith.constant dense<0.000000e+00> : vector<1x128xf32>
    %75 = tpu.matmul %70, %74, %cst_36 {dimension_numbers = #tpu.dot_dimension_numbers<[1], [0], [0], [1], [0, 0, 1, 1], [], []>} : vector<1x16xf32>, vector<16x128xf32>, vector<1x128xf32> -> vector<1x128xf32>
    %c0_37 = arith.constant 0 : index
    %c0_38 = arith.constant 0 : index
    %76 = vector.load %arg8[%c0_37, %c0_38] : memref<16x128xf32, #tpu.memory_space<vmem>>, vector<16x128xf32>
    %cst_39 = arith.constant dense<0.000000e+00> : vector<1x128xf32>
    %77 = tpu.matmul %73, %76, %cst_39 {dimension_numbers = #tpu.dot_dimension_numbers<[1], [0], [0], [1], [0, 0, 1, 1], [], []>} : vector<1x16xf32>, vector<16x128xf32>, vector<1x128xf32> -> vector<1x128xf32>
    %78 = vector.broadcast %75 : vector<1x128xf32> to vector<16x128xf32>
    %79 = arith.mulf %48, %78 : vector<16x128xf32>
    %80 = vector.broadcast %77 : vector<1x128xf32> to vector<16x128xf32>
    %81 = arith.addf %79, %80 : vector<16x128xf32>
    %cst_40 = arith.constant 0.000000e+00 : f32
    %82 = vector.broadcast %cst_40 : f32 to vector<16x128xf32>
    %83 = arith.maximumf %81, %82 : vector<16x128xf32>
    %84 = arith.truncf %83 : vector<16x128xf32> to vector<16x128xbf16>
    %c1_41 = arith.constant 1 : index
    %c0_42 = arith.constant 0 : index
    %c0_43 = arith.constant 0 : index
    %85 = vector.load %arg2[%c1_41, %c0_42, %c0_43] : memref<3x128x128xbf16, #tpu.memory_space<vmem>>, vector<1x128x128xbf16>
    %86 = vector.shape_cast %85 : vector<1x128x128xbf16> to vector<128x128xbf16>
    %cst_44 = arith.constant dense<0.000000e+00> : vector<16x128xf32>
    %87 = tpu.matmul %84, %86, %cst_44 {dimension_numbers = #tpu.dot_dimension_numbers<[1], [0], [0], [1], [0, 0, 1, 1], [], []>} : vector<16x128xbf16>, vector<128x128xbf16>, vector<16x128xf32> -> vector<16x128xf32>
    %c1_i32_45 = arith.constant 1 : i32
    %88 = tpu.dynamic_rotate %83 by %c1_i32_45 dim 0 : vector<16x128xf32>, i32 -> vector<16x128xf32>
    %cst_46 = arith.constant 0.000000e+00 : f32
    %89 = vector.shape_cast %22 : vector<16x1xi1> to vector<16x1xi1>
    %90 = vector.broadcast %89 : vector<16x1xi1> to vector<16x128xi1>
    %91 = vector.broadcast %cst_46 : f32 to vector<16x128xf32>
    %92 = arith.select %90, %88, %91 : vector<16x128xi1>, vector<16x128xf32>
    %93 = arith.truncf %92 : vector<16x128xf32> to vector<16x128xbf16>
    %c0_47 = arith.constant 0 : index
    %c0_48 = arith.constant 0 : index
    %c0_49 = arith.constant 0 : index
    %94 = vector.load %arg2[%c0_47, %c0_48, %c0_49] : memref<3x128x128xbf16, #tpu.memory_space<vmem>>, vector<1x128x128xbf16>
    %95 = vector.shape_cast %94 : vector<1x128x128xbf16> to vector<128x128xbf16>
    %cst_50 = arith.constant dense<0.000000e+00> : vector<16x128xf32>
    %96 = tpu.matmul %93, %95, %cst_50 {dimension_numbers = #tpu.dot_dimension_numbers<[1], [0], [0], [1], [0, 0, 1, 1], [], []>} : vector<16x128xbf16>, vector<128x128xbf16>, vector<16x128xf32> -> vector<16x128xf32>
    %97 = arith.addf %87, %96 : vector<16x128xf32>
    %c15_i32_51 = arith.constant 15 : i32
    %98 = tpu.dynamic_rotate %83 by %c15_i32_51 dim 0 : vector<16x128xf32>, i32 -> vector<16x128xf32>
    %cst_52 = arith.constant 0.000000e+00 : f32
    %99 = vector.shape_cast %24 : vector<16x1xi1> to vector<16x1xi1>
    %100 = vector.broadcast %99 : vector<16x1xi1> to vector<16x128xi1>
    %101 = vector.broadcast %cst_52 : f32 to vector<16x128xf32>
    %102 = arith.select %100, %98, %101 : vector<16x128xi1>, vector<16x128xf32>
    %103 = arith.truncf %102 : vector<16x128xf32> to vector<16x128xbf16>
    %c2_53 = arith.constant 2 : index
    %c0_54 = arith.constant 0 : index
    %c0_55 = arith.constant 0 : index
    %104 = vector.load %arg2[%c2_53, %c0_54, %c0_55] : memref<3x128x128xbf16, #tpu.memory_space<vmem>>, vector<1x128x128xbf16>
    %105 = vector.shape_cast %104 : vector<1x128x128xbf16> to vector<128x128xbf16>
    %cst_56 = arith.constant dense<0.000000e+00> : vector<16x128xf32>
    %106 = tpu.matmul %103, %105, %cst_56 {dimension_numbers = #tpu.dot_dimension_numbers<[1], [0], [0], [1], [0, 0, 1, 1], [], []>} : vector<16x128xbf16>, vector<128x128xbf16>, vector<16x128xf32> -> vector<16x128xf32>
    %107 = arith.addf %97, %106 : vector<16x128xf32>
    %cst_57 = arith.constant dense<0.000000e+00> : vector<128xf32>
    %108 = vector.multi_reduction <add>, %107, %cst_57 [0] : vector<16x128xf32> to vector<128xf32>
    %109 = vector.shape_cast %108 : vector<128xf32> to vector<1x128xf32>
    %c0_58 = arith.constant 0 : index
    %c0_59 = arith.constant 0 : index
    %110 = vector.load %arg7[%c0_58, %c0_59] : memref<128x16xf32, #tpu.memory_space<vmem>>, vector<128x16xf32>
    %cst_60 = arith.constant dense<0.000000e+00> : vector<1x16xf32>
    %111 = tpu.matmul %109, %110, %cst_60 {dimension_numbers = #tpu.dot_dimension_numbers<[1], [0], [0], [1], [0, 0, 1, 1], [], []>} : vector<1x128xf32>, vector<128x16xf32>, vector<1x16xf32> -> vector<1x16xf32>
    %112 = arith.mulf %107, %107 : vector<16x128xf32>
    %cst_61 = arith.constant dense<0.000000e+00> : vector<128xf32>
    %113 = vector.multi_reduction <add>, %112, %cst_61 [0] : vector<16x128xf32> to vector<128xf32>
    %114 = vector.shape_cast %113 : vector<128xf32> to vector<1x128xf32>
    %c0_62 = arith.constant 0 : index
    %c0_63 = arith.constant 0 : index
    %115 = vector.load %arg7[%c0_62, %c0_63] : memref<128x16xf32, #tpu.memory_space<vmem>>, vector<128x16xf32>
    %cst_64 = arith.constant dense<0.000000e+00> : vector<1x16xf32>
    %116 = tpu.matmul %114, %115, %cst_64 {dimension_numbers = #tpu.dot_dimension_numbers<[1], [0], [0], [1], [0, 0, 1, 1], [], []>} : vector<1x128xf32>, vector<128x16xf32>, vector<1x16xf32> -> vector<1x16xf32>
    %cst_65 = arith.constant 1.280000e+02 : f32
    %117 = vector.broadcast %cst_65 : f32 to vector<1x16xf32>
    %118 = arith.divf %111, %117 : vector<1x16xf32>
    %cst_66 = arith.constant 1.280000e+02 : f32
    %119 = vector.broadcast %cst_66 : f32 to vector<1x16xf32>
    %120 = arith.divf %116, %119 : vector<1x16xf32>
    %121 = arith.mulf %118, %118 : vector<1x16xf32>
    %122 = arith.subf %120, %121 : vector<1x16xf32>
    %cst_67 = arith.constant 0.000000e+00 : f32
    %123 = vector.broadcast %cst_67 : f32 to vector<1x16xf32>
    %124 = arith.maximumf %122, %123 : vector<1x16xf32>
    %c0_68 = arith.constant 0 : index
    %c0_69 = arith.constant 0 : index
    %125 = vector.load %arg5[%c0_68, %c0_69] : memref<1x16xf32, #tpu.memory_space<vmem>>, vector<1x16xf32>
    %cst_70 = arith.constant 9.99999974E-6 : f32
    %126 = vector.broadcast %cst_70 : f32 to vector<1x16xf32>
    %127 = arith.addf %124, %126 : vector<1x16xf32>
    %128 = math.rsqrt %127 : vector<1x16xf32>
    %129 = arith.mulf %125, %128 : vector<1x16xf32>
    %c0_71 = arith.constant 0 : index
    %c0_72 = arith.constant 0 : index
    %130 = vector.load %arg6[%c0_71, %c0_72] : memref<1x16xf32, #tpu.memory_space<vmem>>, vector<1x16xf32>
    %131 = arith.mulf %118, %129 : vector<1x16xf32>
    %132 = arith.subf %130, %131 : vector<1x16xf32>
    %c0_73 = arith.constant 0 : index
    %c0_74 = arith.constant 0 : index
    %133 = vector.load %arg8[%c0_73, %c0_74] : memref<16x128xf32, #tpu.memory_space<vmem>>, vector<16x128xf32>
    %cst_75 = arith.constant dense<0.000000e+00> : vector<1x128xf32>
    %134 = tpu.matmul %129, %133, %cst_75 {dimension_numbers = #tpu.dot_dimension_numbers<[1], [0], [0], [1], [0, 0, 1, 1], [], []>} : vector<1x16xf32>, vector<16x128xf32>, vector<1x128xf32> -> vector<1x128xf32>
    %c0_76 = arith.constant 0 : index
    %c0_77 = arith.constant 0 : index
    %135 = vector.load %arg8[%c0_76, %c0_77] : memref<16x128xf32, #tpu.memory_space<vmem>>, vector<16x128xf32>
    %cst_78 = arith.constant dense<0.000000e+00> : vector<1x128xf32>
    %136 = tpu.matmul %132, %135, %cst_78 {dimension_numbers = #tpu.dot_dimension_numbers<[1], [0], [0], [1], [0, 0, 1, 1], [], []>} : vector<1x16xf32>, vector<16x128xf32>, vector<1x128xf32> -> vector<1x128xf32>
    %137 = vector.broadcast %134 : vector<1x128xf32> to vector<16x128xf32>
    %138 = arith.mulf %107, %137 : vector<16x128xf32>
    %139 = vector.broadcast %136 : vector<1x128xf32> to vector<16x128xf32>
    %140 = arith.addf %138, %139 : vector<16x128xf32>
    %cst_79 = arith.constant 0.000000e+00 : f32
    %141 = vector.broadcast %cst_79 : f32 to vector<16x128xf32>
    %142 = arith.maximumf %140, %141 : vector<16x128xf32>
    %c0_80 = arith.constant 0 : index
    %c0_81 = arith.constant 0 : index
    %143 = vector.load %arg9[%c0_80, %c0_81] : memref<16x128xf32, #tpu.memory_space<vmem>>, vector<16x128xf32>
    tpu.vector_store %arg9[%c0_80, %c0_81], %142 {strides = array<i32>} : memref<16x128xf32, #tpu.memory_space<vmem>>, vector<16x128xf32>,
    return
  }
}

</mosaic_0001>

<bundles_post_ra>
// kernel: down_pallas.1
= control target key start
LH: loop header
LB: loop body
LE: loop exit
PB: predicated region body
PF: predicated region fallthrough
CT: control target
= control target key end

     0   :  { %v1922_v1 = vmov 0.0   ;;  %s1923_s11 = smov 96   ;;  %vm1924_vm0 = vmmov 0   ;;  %v1925_v5 = vmov 0.0|0.0   ;;  %v47_v18 = vlaneseq  ;;  %s2384_s0 = inlined_call_operand.vmem [shape: bf16[16,64], index: 0, kind: input, shape index: {}]   ;;  %s2385_s1 = inlined_call_operand.vmem [shape: bf16[3,32,128], index: 1, kind: input, shape index: {}]   ;;  %s2386_s7 = inlined_call_operand.vmem [shape: f32[128,16], index: 7, kind: input, shape index: {}]   ;;  %s2387_s8 = inlined_call_operand.vmem [shape: f32[16,128], index: 8, kind: input, shape index: {}]   ;;  %s2388_s2 = inlined_call_operand.vmem [shape: bf16[3,128,128], index: 2, kind: input, shape index: {}]   ;;  %s2389_s3 = inlined_call_operand.vmem [shape: f32[1,16], index: 3, kind: input, shape index: {}]   ;;  %s2390_s4 = inlined_call_operand.vmem [shape: f32[1,16], index: 4, kind: input, shape index: {}]   ;;  %s2391_s5 = inlined_call_operand.vmem [shape: f32[1,16], index: 5, kind: input, shape index: {}]   ;;  %s2392_s6 = inlined_call_operand.vmem [shape: f32[1,16], index: 6, kind: input, shape index: {}]   ;;  %s2393_s9 = inlined_call_operand.vmem [shape: f32[16,128], index: 9, kind: output, shape index: {}]  }
   0x1   :  { %v33_v0 = vld [vmem:[%s2384_s0] sm:$0xf]  ;;  %1508 = vmatprep.subr.bf16.mxu0 %v1922_v1  ;;  %v34_v3 = vld [vmem:[%s2384_s0 + $0x4] sm:$0xf]  ;;  %v1889_v4 = vld [vmem:[%s2385_s1 + $0x8] sm:$0xff]   ;;  %1512 = vmatprep.mubr.msk.bf16.mxu0 %vm1924_vm0, %v1922_v1  ;;  %vm111_vm4 = vcmask 261120  }
   0x2   :  { %37 = vrot.lane.b32.xlu0 %v33_v0, %s1923_s11  ;;  %v1888_v2 = vld [vmem:[%s2385_s1] sm:$0xff]   ;;  %1564 = vmatprep.mubr.msk.f32.mxu1 %vm1924_vm0, %v1922_v1  ;;  %v300_v7 = vld [vmem:[%s2386_s7 + $0x8] sm:$0xff]  ;;  %v301_v8 = vld [vmem:[%s2386_s7 + $0x10] sm:$0xff]  ;;  %v2036_v19 = vshrl.u32 %v47_v18, 7  ;;  %vm479_vm8 = vcmask 130048  }
   0x3   :  { %1509 = vmatpush3.bf16.msra.mxu0 %v1888_v2  ;;  %1760 = vmatprep.subr.bf16.mxu1 %v1925_v5  ;;  %v299_v6 = vld [vmem:[%s2386_s7] sm:$0xff]  ;;  %v302_v10 = vld [vmem:[%s2386_s7 + $0x18] sm:$0xff]  ;;  %v304_v13 = vld [vmem:[%s2386_s7 + $0x28] sm:$0xff] }
   0x4   :  { %1510 = vmatprep.subr.bf16.mxu0 %v1922_v1  ;;  %v2005_v9 = vpack.c.bf16 %v300_v7, %v299_v6  ;;  %v2011_v11 = vpack.c.bf16 %v302_v10, %v301_v8  ;;  %v303_v12 = vld [vmem:[%s2386_s7 + $0x20] sm:$0xff]  ;;  %v305_v15 = vld [vmem:[%s2386_s7 + $0x30] sm:$0xff]  ;;  %v306_v16 = vld [vmem:[%s2386_s7 + $0x38] sm:$0xff]  ;;  %v49_v22 = vadd.s32 8, %v2036_v19  ;;  %v54_v25 = vand.u32 7, %v2036_v19 }
   0x5   :  { %v2021_v14 = vpack.c.bf16 %v304_v13, %v303_v12  ;;  %v2031_v17 = vpack.c.bf16 %v306_v16, %v305_v15  ;;  %vm85_vm1 = vcmp.lt.s32.totalorder %v2036_v19, 1  ;;  %v1890_v37 = vld [vmem:[%s2385_s1 + $0x10] sm:$0xff]   ;;  %v1891_v39 = vld [vmem:[%s2385_s1 + $0x18] sm:$0xff]   ;;  %v1892_v40 = vld [vmem:[%s2385_s1 + $0x20] sm:$0xff]   ;;  %vm219_vm5 = vcmp.lt.s32.totalorder %v2036_v19, 7 }
   0x6   :  { %39 = vrot.lane.b32.xlu0 %v34_v3, %s1923_s11  ;;  %1762 = vmatpush3.bf16.msra.mxu1 %v2005_v9  ;;  %v61_v26 = vand.u32 7, %v49_v22  ;;  %vm2041_vm2 = vcmp.ge.s32.totalorder %v54_v25, 1  ;;  %v1893_v43 = vld [vmem:[%s2385_s1 + $0x28] sm:$0xff]   ;;  %vm2079_vm6 = vcmp.le.s32.totalorder %v54_v25, 6  ;;  %v307_v52 = vld [vmem:[%s2386_s7 + $0x40] sm:$0xff]  ;;  %v309_v55 = vld [vmem:[%s2386_s7 + $0x50] sm:$0xff] }
   0x7   :  { %1511 = vmatpush3.bf16.msra.mxu0 %v1889_v4  ;;  %1763 = vmatprep.subr.bf16.mxu1 %v1925_v5  ;;  %v308_v53 = vld [vmem:[%s2386_s7 + $0x48] sm:$0xff]  ;;  %v310_v56 = vld [vmem:[%s2386_s7 + $0x58] sm:$0xff]  ;;  %v311_v58 = vld [vmem:[%s2386_s7 + $0x60] sm:$0xff] }
   0x8   :  { %1516 = vmatprep.subr.bf16.mxu0 %v1922_v1  ;;  %vm2045_vm3 = vcmp.ge.s32.totalorder %v61_v26, 1  ;;  %vm2083_vm7 = vcmp.le.s32.totalorder %v61_v26, 6  ;;  %v2113_v54 = vpack.c.bf16 %v308_v53, %v307_v52  ;;  %v2125_v57 = vpack.c.bf16 %v310_v56, %v309_v55  ;;  %v312_v59 = vld [vmem:[%s2386_s7 + $0x68] sm:$0xff]  ;;  %v313_v61 = vld [vmem:[%s2386_s7 + $0x70] sm:$0xff]  ;;  %v314_v62 = vld [vmem:[%s2386_s7 + $0x78] sm:$0xff] }
   0x9   :  { %v2137_v60 = vpack.c.bf16 %v312_v59, %v311_v58  ;;  %v2149_v63 = vpack.c.bf16 %v314_v62, %v313_v61  ;;  %v1896_v52 = vld [vmem:[%s2388_s2 + $0x10] sm:$0xff]   ;;  %v1897_v53 = vld [vmem:[%s2388_s2 + $0x18] sm:$0xff]   ;;  %v1898_v55 = vld [vmem:[%s2388_s2 + $0x20] sm:$0xff]   ;;  %v2242_v61 = vsub.s32 0, %v2036_v19 }
   0xa   :  { %1765 = vmatpush3.bf16.msra.mxu1 %v2011_v11  ;;  %v1899_v56 = vld [vmem:[%s2388_s2 + $0x28] sm:$0xff]   ;;  %v1900_v58 = vld [vmem:[%s2388_s2 + $0x30] sm:$0xff]   ;;  %v1901_v59 = vld [vmem:[%s2388_s2 + $0x38] sm:$0xff]  }
   0xb   :  { %1766 = vmatprep.subr.bf16.mxu1 %v1925_v5  ;;  %vm1352_vm9 = vmpackc.low %vm2045_vm3, %vm2041_vm2  ;;  %v1904_v19 = vld [vmem:[%s2388_s2 + $0x50] sm:$0xff]   ;;  %v1905_v31 = vld [vmem:[%s2388_s2 + $0x58] sm:$0xff]  }
   0xc   :  { %v1906_v32 = vld [vmem:[%s2388_s2 + $0x60] sm:$0xff]   ;;  %vm1387_vm10 = vmpackc.low %vm2083_vm7, %vm2079_vm6 }
   0xe   :  { %1768 = vmatpush3.bf16.msra.mxu1 %v2021_v14 }
   0xf   :  { %1769 = vmatprep.subr.bf16.mxu1 %v1925_v5 }
  0x12   :  { %1771 = vmatpush3.bf16.msra.mxu1 %v2031_v17 }
  0x13   :  { %1772 = vmatprep.subr.bf16.mxu1 %v1925_v5 }
  0x16   :  { %1774 = vmatpush3.bf16.msra.mxu1 %v2113_v54 }
  0x17   :  { %1775 = vmatprep.subr.bf16.mxu1 %v1925_v5 }
  0x1a   :  { %1777 = vmatpush3.bf16.msra.mxu1 %v2125_v57 }
  0x1b   :  { %1778 = vmatprep.subr.bf16.mxu1 %v1925_v5 }
  0x1e   :  { %1780 = vmatpush3.bf16.msra.mxu1 %v2137_v60 }
  0x1f   :  { %1781 = vmatprep.subr.bf16.mxu1 %v1925_v5 }
  0x22   :  { %1783 = vmatpush3.bf16.msra.mxu1 %v2149_v63 }
  0x23   :  { %1811 = vmatprep.subr.bf16.mxu1 %v1925_v5 }
  0x74   :  { %v38_v20 = vpop.permute.xlu0 %37 }
  0x75   :  { %v43_v21 = vmax.bf16 %v38_v20, %v33_v0 }
  0x77   :  { %v45_v24 = vunpack.c.l.bf16 %v43_v21 }
  0x78   :  { %v40_v23 = vpop.permute.xlu0 %39 }
  0x79   :  { %v44_v27 = vmax.bf16 %v40_v23, %v34_v3  ;;  %v83_v29 = vrot.slane %v45_v24, 7  ;;  %v217_v44 = vrot.slane %v45_v24, 1 }
  0x7b   :  { %v46_v28 = vunpack.c.l.bf16 %v44_v27  ;;  %v1315_v41 = vcombine.low %v43_v21, %v44_v27  ;;  %v477_v27 = vld [vmem:[%s2387_s8] sm:$0xff] }
  0x7d   :  { %v84_v30 = vrot.slane %v46_v28, 7  ;;  %v218_v42 = vrot.slane %v46_v28, 1  ;;  %v478_v28 = vld [vmem:[%s2387_s8 + $0x8] sm:$0xff] }
  0x7f   :  { %v86_v33 = vsel %vm85_vm1, %v83_v29, %v84_v30  ;;  %v87_v34 = vsel %vm85_vm1, %v84_v30, %v83_v29  ;;  %v220_v47 = vsel %vm219_vm5, %v217_v44, %v218_v42  ;;  %v221_v48 = vsel %vm219_vm5, %v218_v42, %v217_v44  ;;  %v470_v42 = vld [vmem:[%s2389_s3] sm:$0x1] }
  0x80   :  { %v92_v35 = vsel %vm2041_vm2, %v87_v34, 0.0  ;;  %v93_v36 = vsel %vm2045_vm3, %v86_v33, 0.0  ;;  %v226_v49 = vsel %vm2079_vm6, %v220_v47, 0.0  ;;  %v227_v50 = vsel %vm2083_vm7, %v221_v48, 0.0  ;;  %v474_v47 = vld [vmem:[%s2390_s4] sm:$0x1] }
  0x81   :  { %v94_v38 = vpack.c.bf16 %v93_v36, %v92_v35  ;;  %v228_v51 = vpack.c.bf16 %v227_v50, %v226_v49  ;;  %v2175_v29 = vpack.c.bf16 %v478_v28, %v477_v27  ;;  %v1894_v49 = vld [vmem:[%s2388_s2] sm:$0xff]  }
  0x82   :  { %v1902_v27 = vld [vmem:[%s2388_s2 + $0x40] sm:$0xff]  }
  0x83   :  { %1513 = vmatmul.mubr.msk.bf16.vlgmr.msra.gmra.mrb[0].mxu0 %vm111_vm4, %v94_v38 }
  0x84   :  { %1517 = vmatpush3.bf16.msra.mxu0 %v1890_v37  ;;  %1520 = vmatprep.mubr.msk.bf16.mxu0 %vm1924_vm0, %v1922_v1 }
  0x85   :  { %1518 = vmatprep.subr.bf16.mxu0 %v1922_v1 }
  0x88   :  { %1519 = vmatpush3.bf16.msra.mxu0 %v1891_v39 }
  0x89   :  { %1524 = vmatprep.subr.bf16.mxu0 %v1922_v1 }
  0x8f   :  { %1521 = vmatmul.mubr.msk.bf16.vlgmr.msra.gmra.mrb[0].mxu0 %vm111_vm4, %v1315_v41 }
  0x90   :  { %1525 = vmatpush3.bf16.msra.mxu0 %v1892_v40  ;;  %1528 = vmatprep.mubr.msk.bf16.mxu0 %vm1924_vm0, %v1922_v1 }
  0x91   :  { %1526 = vmatprep.subr.bf16.mxu0 %v1922_v1 }
  0x94   :  { %1527 = vmatpush3.bf16.msra.mxu0 %v1893_v43 }
  0x95   :  { %1784 = vmatprep.subr.bf16.mxu0 %v1925_v5 }
  0x9b   :  { %1529 = vmatmul.mubr.msk.bf16.vlgmr.msra.gmra.mrb[0].mxu0 %vm111_vm4, %v228_v51  ;;  %v1895_v51 = vld [vmem:[%s2388_s2 + $0x8] sm:$0xff]  }
  0x9c   :  { %1786 = vmatpush3.bf16.msra.mxu0 %v2005_v9  ;;  %1599 = vmatprep.mubr.msk.f32.mxu0 %vm1924_vm0, %v1922_v1 }
  0x9d   :  { %1787 = vmatprep.subr.bf16.mxu0 %v1925_v5 }
  0xa0   :  { %1789 = vmatpush3.bf16.msra.mxu0 %v2011_v11 }
  0xa1   :  { %1790 = vmatprep.subr.bf16.mxu0 %v1925_v5 }
  0xa4   :  { %1792 = vmatpush3.bf16.msra.mxu0 %v2021_v14 }
  0xa5   :  { %1793 = vmatprep.subr.bf16.mxu0 %v1925_v5 }
  0xa8   :  { %1795 = vmatpush3.bf16.msra.mxu0 %v2031_v17 }
  0xa9   :  { %1796 = vmatprep.subr.bf16.mxu0 %v1925_v5 }
  0xac   :  { %1798 = vmatpush3.bf16.msra.mxu0 %v2113_v54 }
  0xad   :  { %1799 = vmatprep.subr.bf16.mxu0 %v1925_v5 }
  0xb0   :  { %1801 = vmatpush3.bf16.msra.mxu0 %v2125_v57 }
  0xb1   :  { %1802 = vmatprep.subr.bf16.mxu0 %v1925_v5 }
  0xb4   :  { %1804 = vmatpush3.bf16.msra.mxu0 %v2137_v60 }
  0xb5   :  { %1805 = vmatprep.subr.bf16.mxu0 %v1925_v5 }
  0xb8   :  { %1807 = vmatpush3.bf16.msra.mxu0 %v2149_v63 }
  0xb9   :  { %1808 = vmatprep.subr.bf16.mxu0 %v1925_v5 }
 0x16e   :  { %v2155_v0 = vpop.f32.mrb[0].mxu0 }
 0x16f   :  { %v1530_v2 = vpop.f32.mrb[1].mxu0  ;;  %v385_v4 = vmul.f32 %v2155_v0, %v2155_v0 }
 0x170   :  { %v2157_v3 = vpop.f32.mrb[2].mxu0 }
 0x171   :  { %v292_v6 = vadd.f32 %v2157_v3, %v2155_v0  ;;  %v386_v7 = vmul.f32 %v2157_v3, %v2157_v3  ;;  %v1531_v8 = vpop.f32.mrb[3].mxu0 }
 0x173   :  { %v293_v10 = vrot.slane %v292_v6, 4  ;;  %v387_v12 = vadd.f32 %v386_v7, %v385_v4 }
 0x175   :  { %v294_v13 = vadd.f32 %v293_v10, %v292_v6  ;;  %v388_v15 = vrot.slane %v387_v12, 4 }
 0x177   :  { %v295_v16 = vrot.slane %v294_v13, 2  ;;  %v389_v18 = vadd.f32 %v388_v15, %v387_v12 }
 0x179   :  { %v390_v20 = vrot.slane %v389_v18, 2  ;;  %v296_v21 = vadd.f32 %v295_v16, %v294_v13 }
 0x17b   :  { %v297_v22 = vrot.slane %v296_v21, 1  ;;  %v391_v23 = vadd.f32 %v390_v20, %v389_v18 }
 0x17d   :  { %v298_v24 = vadd.f32 %v297_v22, %v296_v21  ;;  %v392_v25 = vrot.slane %v391_v23, 1 }
 0x17f   :  { %1565 = vmatmul.mubr.f32.vlgmr.msra.gmra.mrb[0].mxu1 %v298_v24  ;;  %v393_v26 = vadd.f32 %v392_v25, %v391_v23 }
 0x180   :  { %1613 = vmatprep.mubr.msk.f32.mxu1 %vm1924_vm0, %v1922_v1  ;;  %1813 = vmatpush3.bf16.msra.mxu1 %v2175_v29 }
 0x181   :  { %1600 = vmatmul.mubr.f32.vlgmr.msra.gmra.mrb[4].mxu0 %v393_v26  ;;  %1616 = vmatprep.subr.bf16.mxu1 %v1922_v1 }
 0x182   :  { %1606 = vmatprep.mubr.msk.f32.mxu0 %vm1924_vm0, %v1922_v1  ;;  %1810 = vmatpush3.bf16.msra.mxu0 %v2175_v29 }
 0x183   :  { %1814 = vmatprep.subr.bf16.mxu0 %v1925_v5 }
 0x252   :  { %v381_v30 = vpop.f32.mrb[0].mxu1 }
 0x253   :  { %v465_v33 = vmul.f32 0.0078125, %v381_v30  ;;  %v1566_v34 = vpop.f32.mrb[1].mxu1 }
 0x254   :  { %v460_v35 = vpop.f32.mrb[4].mxu0  ;;  %v1907_v34 = vld [vmem:[%s2388_s2 + $0x68] sm:$0xff]  }
 0x255   :  { %v467_v36 = vmul.f32 %v465_v33, %v465_v33  ;;  %v466_v37 = vmul.f32 0.0078125, %v460_v35  ;;  %v1601_v38 = vpop.f32.mrb[5].mxu0  ;;  %v1908_v35 = vld [vmem:[%s2388_s2 + $0x70] sm:$0xff]  }
 0x256   :  { %v1911_v38 = vld [vmem:[%s2388_s2 + $0x88] sm:$0xff]  }
 0x257   :  { %v468_v39 = vsub.f32 %v466_v37, %v467_v36  ;;  %v1909_v36 = vld [vmem:[%s2388_s2 + $0x78] sm:$0xff]   ;;  %v1910_v37 = vld [vmem:[%s2388_s2 + $0x80] sm:$0xff]  }
 0x259   :  { %v469_v40 = vmax.f32 %v468_v39, 0.0  ;;  %v1912_v39 = vld [vmem:[%s2388_s2 + $0x90] sm:$0xff]  }
 0x25b   :  { %v471_v41 = vadd.f32 1e-05, %v469_v40  ;;  %v1913_v40 = vld [vmem:[%s2388_s2 + $0x98] sm:$0xff]  }
 0x25d   :  { %1918 = vrsqrt.f32 %v471_v41  ;;  %v1914_v41 = vld [vmem:[%s2388_s2 + $0xa0] sm:$0xff]  }
 0x267   :  { %v1919_v43 = vpop.eup %1918 }
 0x268   :  { %v473_v44 = vmul.f32 %v1919_v43, %v470_v42  ;;  %v1915_v42 = vld [vmem:[%s2388_s2 + $0xa8] sm:$0xff]   ;;  %v1916_v43 = vld [vmem:[%s2388_s2 + $0xb0] sm:$0xff]  }
 0x26a   :  { %1607 = vmatmul.mubr.msk.f32.vlgmr.msra.gmra.mrb[6].mxu0 %vm479_vm8, %v473_v44  ;;  %v475_v48 = vmul.f32 %v473_v44, %v465_v33  ;;  %v1903_v33 = vld [vmem:[%s2388_s2 + $0x48] sm:$0xff]   ;;  %v1917_v44 = vld [vmem:[%s2388_s2 + $0xb8] sm:$0xff]  }
 0x26b   :  { %1816 = vmatpush3.bf16.msra.mxu0 %v2005_v9  ;;  %1708 = vmatprep.mubr.msk.f32.mxu0 %vm1924_vm0, %v1922_v1 }
 0x26c   :  { %v476_v50 = vsub.f32 %v474_v47, %v475_v48  ;;  %1817 = vmatprep.subr.bf16.mxu0 %v1925_v5 }
 0x26e   :  { %1614 = vmatmul.mubr.msk.f32.vlgmr.msra.gmra.mrb[2].mxu1 %vm479_vm8, %v476_v50 }
 0x26f   :  { %1617 = vmatpush3.bf16.msra.mxu1 %v1894_v49  ;;  %1632 = vmatprep.mubr.msk.bf16.mxu1 %vm1924_vm0, %v1922_v1 }
 0x270   :  { %1618 = vmatprep.subr.bf16.mxu1 %v1922_v1  ;;  %1819 = vmatpush3.bf16.msra.mxu0 %v2011_v11 }
 0x271   :  { %1820 = vmatprep.subr.bf16.mxu0 %v1925_v5 }
 0x273   :  { %1619 = vmatpush3.bf16.msra.mxu1 %v1895_v51 }
 0x274   :  { %1620 = vmatprep.subr.bf16.mxu1 %v1922_v1  ;;  %1822 = vmatpush3.bf16.msra.mxu0 %v2021_v14 }
 0x275   :  { %1823 = vmatprep.subr.bf16.mxu0 %v1925_v5 }
 0x277   :  { %1621 = vmatpush3.bf16.msra.mxu1 %v1896_v52 }
 0x278   :  { %1622 = vmatprep.subr.bf16.mxu1 %v1922_v1  ;;  %1825 = vmatpush3.bf16.msra.mxu0 %v2031_v17 }
 0x279   :  { %1826 = vmatprep.subr.bf16.mxu0 %v1925_v5 }
 0x27b   :  { %1623 = vmatpush3.bf16.msra.mxu1 %v1897_v53 }
 0x27c   :  { %1624 = vmatprep.subr.bf16.mxu1 %v1922_v1  ;;  %1828 = vmatpush3.bf16.msra.mxu0 %v2113_v54 }
 0x27d   :  { %1829 = vmatprep.subr.bf16.mxu0 %v1925_v5 }
 0x27f   :  { %1625 = vmatpush3.bf16.msra.mxu1 %v1898_v55 }
 0x280   :  { %1831 = vmatpush3.bf16.msra.mxu0 %v2125_v57  ;;  %1626 = vmatprep.subr.bf16.mxu1 %v1922_v1 }
 0x281   :  { %1832 = vmatprep.subr.bf16.mxu0 %v1925_v5 }
 0x283   :  { %1627 = vmatpush3.bf16.msra.mxu1 %v1899_v56 }
 0x284   :  { %1834 = vmatpush3.bf16.msra.mxu0 %v2137_v60  ;;  %1628 = vmatprep.subr.bf16.mxu1 %v1922_v1 }
 0x285   :  { %1835 = vmatprep.subr.bf16.mxu0 %v1925_v5 }
 0x287   :  { %1629 = vmatpush3.bf16.msra.mxu1 %v1900_v58 }
 0x288   :  { %1837 = vmatpush3.bf16.msra.mxu0 %v2149_v63  ;;  %1630 = vmatprep.subr.bf16.mxu1 %v1922_v1 }
 0x289   :  { %1838 = vmatprep.subr.bf16.mxu0 %v1925_v5 }
 0x28b   :  { %1631 = vmatpush3.bf16.msra.mxu1 %v1901_v59 }
 0x28c   :  { %1636 = vmatprep.subr.bf16.mxu1 %v1922_v1 }
 0x33d   :  { %v549_v62 = vpop.f32.mrb[6].mxu0 }
 0x33e   :  { %v629_v2 = vrot.slane %v549_v62, %v2242_v61  ;;  %v1608_v4 = vpop.f32.mrb[7].mxu0 }
 0x340   :  { %v630_v6 = vmul.f32 %v629_v2, %v2155_v0  ;;  %v631_v7 = vmul.f32 %v629_v2, %v2157_v3 }
 0x341   :  { %v622_v8 = vpop.f32.mrb[2].mxu1 }
 0x342   :  { %v635_v10 = vrot.slane %v622_v8, %v2242_v61  ;;  %v1615_v12 = vpop.f32.mrb[3].mxu1 }
 0x344   :  { %v636_v13 = vadd.f32 %v635_v10, %v630_v6  ;;  %v637_v15 = vadd.f32 %v635_v10, %v631_v7 }
 0x346   :  { %v638_v16 = vmax.f32 %v636_v13, 0.0  ;;  %v639_v18 = vmax.f32 %v637_v15, 0.0  ;;  %v1135_v15 = vld [vmem:[%s2391_s5] sm:$0x1] }
 0x348   :  { %v658_v20 = vrot.slane %v638_v16, 7  ;;  %v659_v21 = vrot.slane %v639_v18, 7  ;;  %v859_v22 = vrot.slane %v638_v16, 1  ;;  %v860_v23 = vrot.slane %v639_v18, 1 }
 0x349   :  { %v640_v24 = vpack.c.bf16 %v639_v18, %v638_v16 }
 0x34a   :  { %v660_v25 = vsel %vm85_vm1, %v658_v20, %v659_v21  ;;  %v661_v0 = vsel %vm85_vm1, %v659_v21, %v658_v20  ;;  %v861_v3 = vsel %vm219_vm5, %v859_v22, %v860_v23  ;;  %v862_v26 = vsel %vm219_vm5, %v860_v23, %v859_v22 }
 0x34b   :  { %v1353_v28 = vpack.c.bf16 %v660_v25, %v661_v0  ;;  %v1388_v30 = vpack.c.bf16 %v862_v26, %v861_v3 }
 0x34d   :  { %1633 = vmatmul.mubr.msk.bf16.vlgmr.msra.gmra.mrb[4].mxu1 %vm1352_vm9, %v1353_v28 }
 0x34e   :  { %1637 = vmatpush3.bf16.msra.mxu1 %v1902_v27  ;;  %1652 = vmatprep.mubr.msk.bf16.mxu1 %vm1924_vm0, %v1922_v1 }
 0x34f   :  { %1638 = vmatprep.subr.bf16.mxu1 %v1922_v1 }
 0x352   :  { %1639 = vmatpush3.bf16.msra.mxu1 %v1903_v33 }
 0x353   :  { %1640 = vmatprep.subr.bf16.mxu1 %v1922_v1 }
 0x356   :  { %1641 = vmatpush3.bf16.msra.mxu1 %v1904_v19 }
 0x357   :  { %1642 = vmatprep.subr.bf16.mxu1 %v1922_v1 }
 0x35a   :  { %1643 = vmatpush3.bf16.msra.mxu1 %v1905_v31 }
 0x35b   :  { %1644 = vmatprep.subr.bf16.mxu1 %v1922_v1 }
 0x35e   :  { %1645 = vmatpush3.bf16.msra.mxu1 %v1906_v32 }
 0x35f   :  { %1646 = vmatprep.subr.bf16.mxu1 %v1922_v1 }
 0x362   :  { %1647 = vmatpush3.bf16.msra.mxu1 %v1907_v34 }
 0x363   :  { %1648 = vmatprep.subr.bf16.mxu1 %v1922_v1 }
 0x366   :  { %1649 = vmatpush3.bf16.msra.mxu1 %v1908_v35 }
 0x367   :  { %1650 = vmatprep.subr.bf16.mxu1 %v1922_v1 }
 0x36a   :  { %1651 = vmatpush3.bf16.msra.mxu1 %v1909_v36 }
 0x36b   :  { %1656 = vmatprep.subr.bf16.mxu1 %v1922_v1 }
 0x36d   :  { %1653 = vmatmul.mubr.bf16.vlgmr.msra.gmra.mrb[4].mxu1 %v640_v24 }
 0x36e   :  { %1657 = vmatpush3.bf16.msra.mxu1 %v1910_v37  ;;  %1672 = vmatprep.mubr.msk.bf16.mxu1 %vm1924_vm0, %v1922_v1 }
 0x36f   :  { %1658 = vmatprep.subr.bf16.mxu1 %v1922_v1 }
 0x372   :  { %1659 = vmatpush3.bf16.msra.mxu1 %v1911_v38 }
 0x373   :  { %1660 = vmatprep.subr.bf16.mxu1 %v1922_v1 }
 0x376   :  { %1661 = vmatpush3.bf16.msra.mxu1 %v1912_v39 }
 0x377   :  { %1662 = vmatprep.subr.bf16.mxu1 %v1922_v1 }
 0x37a   :  { %1663 = vmatpush3.bf16.msra.mxu1 %v1913_v40 }
 0x37b   :  { %1664 = vmatprep.subr.bf16.mxu1 %v1922_v1 }
 0x37e   :  { %1665 = vmatpush3.bf16.msra.mxu1 %v1914_v41 }
 0x37f   :  { %1666 = vmatprep.subr.bf16.mxu1 %v1922_v1 }
 0x382   :  { %1667 = vmatpush3.bf16.msra.mxu1 %v1915_v42 }
 0x383   :  { %1668 = vmatprep.subr.bf16.mxu1 %v1922_v1 }
 0x386   :  { %1669 = vmatpush3.bf16.msra.mxu1 %v1916_v43 }
 0x387   :  { %1670 = vmatprep.subr.bf16.mxu1 %v1922_v1 }
 0x38a   :  { %1671 = vmatpush3.bf16.msra.mxu1 %v1917_v44 }
 0x38d   :  { %1673 = vmatmul.mubr.msk.bf16.vlgmr.msra.gmra.mrb[4].mxu1 %vm1387_vm10, %v1388_v30 }
 0x460   :  { %v2331_v47 = vpop.f32.mrb[4].mxu1 }
 0x461   :  { %v1674_v48 = vpop.f32.mrb[5].mxu1  ;;  %v1051_v50 = vmul.f32 %v2331_v47, %v2331_v47 }
 0x462   :  { %v2333_v49 = vpop.f32.mrb[6].mxu1 }
 0x463   :  { %v974_v51 = vadd.f32 %v2333_v49, %v2331_v47  ;;  %v1052_v52 = vmul.f32 %v2333_v49, %v2333_v49  ;;  %v1675_v53 = vpop.f32.mrb[7].mxu1 }
 0x465   :  { %v975_v45 = vrot.slane %v974_v51, 4  ;;  %v1053_v55 = vadd.f32 %v1052_v52, %v1051_v50 }
 0x467   :  { %v976_v46 = vadd.f32 %v975_v45, %v974_v51  ;;  %v1054_v2 = vrot.slane %v1053_v55, 4 }
 0x469   :  { %v977_v56 = vrot.slane %v976_v46, 2  ;;  %v1055_v4 = vadd.f32 %v1054_v2, %v1053_v55 }
 0x46b   :  { %v978_v58 = vadd.f32 %v977_v56, %v976_v46 }
 0x46d   :  { %v979_v59 = vrot.slane %v978_v58, 1 }
 0x46f   :  { %v980_v62 = vadd.f32 %v979_v59, %v978_v58 }
 0x471   :  { %1709 = vmatmul.mubr.f32.vlgmr.msra.gmra.mrb[8].mxu0 %v980_v62 }
 0x472   :  { %1840 = vmatpush3.bf16.msra.mxu0 %v2005_v9  ;;  %1743 = vmatprep.mubr.msk.f32.mxu0 %vm1924_vm0, %v1922_v1  ;;  %v1056_v9 = vrot.slane %v1055_v4, 2 }
 0x473   :  { %1841 = vmatprep.subr.bf16.mxu0 %v1925_v5 }
 0x476   :  { %1843 = vmatpush3.bf16.msra.mxu0 %v2011_v11  ;;  %v1057_v11 = vadd.f32 %v1056_v9, %v1055_v4 }
 0x477   :  { %1844 = vmatprep.subr.bf16.mxu0 %v1925_v5 }
 0x47a   :  { %1846 = vmatpush3.bf16.msra.mxu0 %v2021_v14  ;;  %v1058_v14 = vrot.slane %v1057_v11, 1 }
 0x47b   :  { %1847 = vmatprep.subr.bf16.mxu0 %v1925_v5 }
 0x47e   :  { %1849 = vmatpush3.bf16.msra.mxu0 %v2031_v17  ;;  %v1059_v17 = vadd.f32 %v1058_v14, %v1057_v11 }
 0x47f   :  { %1850 = vmatprep.subr.bf16.mxu0 %v1925_v5 }
 0x482   :  { %1852 = vmatpush3.bf16.msra.mxu0 %v2113_v54 }
 0x483   :  { %1853 = vmatprep.subr.bf16.mxu0 %v1925_v5 }
 0x486   :  { %1855 = vmatpush3.bf16.msra.mxu0 %v2125_v57 }
 0x487   :  { %1856 = vmatprep.subr.bf16.mxu0 %v1925_v5 }
 0x48a   :  { %1858 = vmatpush3.bf16.msra.mxu0 %v2137_v60 }
 0x48b   :  { %1859 = vmatprep.subr.bf16.mxu0 %v1925_v5 }
 0x48e   :  { %1861 = vmatpush3.bf16.msra.mxu0 %v2149_v63 }
 0x48f   :  { %1862 = vmatprep.subr.bf16.mxu0 %v1925_v5 }
 0x491   :  { %1744 = vmatmul.mubr.f32.vlgmr.msra.gmra.mrb[10].mxu0 %v1059_v17 }
 0x492   :  { %1864 = vmatpush3.bf16.msra.mxu0 %v2175_v29  ;;  %1750 = vmatprep.mubr.msk.f32.mxu0 %vm1924_vm0, %v1922_v1 }
 0x493   :  { %1865 = vmatprep.subr.bf16.mxu0 %v1925_v5  ;;  %v1139_v5 = vld [vmem:[%s2392_s6] sm:$0x1] }
 0x544   :  { %v1047_v54 = vpop.f32.mrb[8].mxu0 }
 0x545   :  { %v1710_v57 = vpop.f32.mrb[9].mxu0  ;;  %v1130_v6 = vmul.f32 0.0078125, %v1047_v54 }
 0x547   :  { %v1132_v7 = vmul.f32 %v1130_v6, %v1130_v6 }
 0x564   :  { %v1126_v60 = vpop.f32.mrb[10].mxu0 }
 0x565   :  { %v1131_v8 = vmul.f32 0.0078125, %v1126_v60  ;;  %v1745_v10 = vpop.f32.mrb[11].mxu0 }
 0x567   :  { %v1133_v12 = vsub.f32 %v1131_v8, %v1132_v7 }
 0x569   :  { %v1134_v63 = vmax.f32 %v1133_v12, 0.0 }
 0x56b   :  { %v1136_v13 = vadd.f32 1e-05, %v1134_v63 }
 0x56d   :  { %1920 = vrsqrt.f32 %v1136_v13 }
 0x577   :  { %v1921_v16 = vpop.eup %1920 }
 0x578   :  { %v1138_v18 = vmul.f32 %v1921_v16, %v1135_v15 }
 0x57a   :  { %1751 = vmatmul.mubr.msk.f32.vlgmr.msra.gmra.mrb[12].mxu0 %vm479_vm8, %v1138_v18  ;;  %v1140_v20 = vmul.f32 %v1138_v18, %v1130_v6 }
 0x57b   :  { %1867 = vmatpush3.bf16.msra.mxu0 %v2175_v29  ;;  %1757 = vmatprep.mubr.msk.f32.mxu0 %vm1924_vm0, %v1922_v1 }
 0x57c   :  { %v1141_v21 = vsub.f32 %v1139_v5, %v1140_v20 }
 0x57e   :  { %1758 = vmatmul.mubr.msk.f32.vlgmr.msra.gmra.mrb[14].mxu0 %vm479_vm8, %v1141_v21 }
 0x64d   :  { %v1211_v22 = vpop.f32.mrb[12].mxu0 }
 0x64e   :  { %v1291_v23 = vrot.slane %v1211_v22, %v2242_v61  ;;  %v1752_v24 = vpop.f32.mrb[13].mxu0 }
 0x650   :  { %v1292_v25 = vmul.f32 %v1291_v23, %v2331_v47  ;;  %v1293_v0 = vmul.f32 %v1291_v23, %v2333_v49 }
 0x651   :  { %v1284_v3 = vpop.f32.mrb[14].mxu0 }
 0x652   :  { %v1297_v26 = vrot.slane %v1284_v3, %v2242_v61  ;;  %v1759_v27 = vpop.f32.mrb[15].mxu0 }
 0x654   :  { %v1298_v28 = vadd.f32 %v1297_v26, %v1292_v25  ;;  %v1299_v29 = vadd.f32 %v1297_v26, %v1293_v0 }
 0x656   :  { %v1300_v30 = vmax.f32 %v1298_v28, 0.0  ;;  %v1301_v33 = vmax.f32 %v1299_v29, 0.0 }
 0x658   :  { %1302 = vst [vmem:[%s2393_s9] sm:$0xff] %v1300_v30  ;;  %1303 = vst [vmem:[%s2393_s9 + $0x8] sm:$0xff] %v1301_v33 }

</bundles_post_ra>
